<compile_context>
chip_gen: v7x
topology: tpu7x:2x2x1
jax: 0.10.0
libtpu: 0.0.40
codegen_flags: <defaults>
</compile_context>

<pallas_src>
import functools

import jax
import jax.numpy as jnp
from jax.experimental import pallas as pl
from jax.experimental.pallas import tpu as pltpu


def _round_up(x, m):
    return (x + m - 1) // m * m


def _ffn_kernel(x_ref, w1_ref, b1_ref, w2_ref, b2_ref, o_ref, acc_ref):
    # x_ref : (tm, d_model_p)  bf16   row tile (invariant along k)
    # w1_ref: (d_model_p, tf)  bf16   k-th column block of W1^T
    # b1_ref: (1, tf)          f32    k-th slice of b1
    # w2_ref: (tf, d_model_p)  bf16   k-th row block of W2^T
    # b2_ref: (1, d_model_p)   f32
    # o_ref : (tm, d_model_p)         output row tile (resident across k)
    # acc_ref:(tm, d_model_p)  f32    accumulator scratch
    k = pl.program_id(1)

    @pl.when(k == 0)
    def _():
        acc_ref[...] = jnp.zeros_like(acc_ref)

    # First matmul for this d_ff slice + bias + ReLU.  Exact: the ReLU acts on
    # a complete, disjoint slice of the hidden vector, so k-tiling does not
    # change the math.
    h = jnp.dot(x_ref[...], w1_ref[...],
                preferred_element_type=jnp.float32) + b1_ref[...]
    h = jnp.maximum(h, 0.0)                      # ReLU on the VPU (f32)

    # Second matmul: accumulate partial products over d_ff tiles.
    acc_ref[...] += jnp.dot(h.astype(w2_ref.dtype), w2_ref[...],
                            preferred_element_type=jnp.float32)

    @pl.when(k == pl.num_programs(1) - 1)
    def _():
        o_ref[...] = (acc_ref[...] + b2_ref[...]).astype(o_ref.dtype)


@functools.partial(jax.jit, static_argnames=("tile_m", "tile_f"))
def feed_forward(x, w1_t, b1, w2_t, b2, *, tile_m=256, tile_f=512):
    """Position-wise FFN.  x: (B, S, d_model) -> (B, S, d_model).

    w1_t: (d_model, d_ff) == W1^T;  b1: (1, d_ff)
    w2_t: (d_ff, d_model) == W2^T;  b2: (1, d_model)
    """
    B, S, d_model = x.shape
    d_ff = w1_t.shape[1]
    M = B * S

    # ---- padded / tiled geometry (all static under jit) --------------------
    d_model_p = _round_up(d_model, 128)            # lane-dense last dim
    tm = min(tile_m, _round_up(M, 8))              # sublane-aligned row tile
    M_p = _round_up(M, tm)
    tf = min(tile_f, _round_up(d_ff, 128))         # d_ff (reduction) tile
    d_ff_p = _round_up(d_ff, tf)

    # ---- pad + cast operands (zero padding keeps the math exact) -----------
    x2d = x.reshape(M, d_model)
    xp = jnp.pad(x2d, ((0, M_p - M), (0, d_model_p - d_model))).astype(jnp.bfloat16)
    w1p = jnp.pad(w1_t, ((0, d_model_p - d_model), (0, d_ff_p - d_ff))).astype(jnp.bfloat16)
    b1p = jnp.pad(b1.reshape(1, d_ff), ((0, 0), (0, d_ff_p - d_ff))).astype(jnp.float32)
    w2p = jnp.pad(w2_t, ((0, d_ff_p - d_ff), (0, d_model_p - d_model))).astype(jnp.bfloat16)
    b2p = jnp.pad(b2.reshape(1, d_model), ((0, 0), (0, d_model_p - d_model))).astype(jnp.float32)

    grid = (M_p // tm, d_ff_p // tf)

    # ---- VMEM budget: double-buffered inputs/outputs + f32 accumulator -----
    out_item = jnp.dtype(x.dtype).itemsize
    vmem_est = (2 * tm * d_model_p * 2                       # x tiles (bf16)
                + 2 * d_model_p * tf * 2                     # W1^T tiles (bf16)
                + 2 * tf * d_model_p * 2                     # W2^T tiles (bf16)
                + 2 * 8 * tf * 4 + 2 * 8 * d_model_p * 4     # biases (sublane-padded)
                + 2 * tm * d_model_p * out_item              # output tiles
                + tm * d_model_p * 4)                        # accumulator scratch
    vmem_limit = min(max(int(vmem_est * 1.5), 32 << 20), 56 << 20)

    cost = pl.CostEstimate(
        flops=4 * M * d_model * d_ff,                        # two matmuls, 2*M*K*N each
        transcendentals=0,
        bytes_accessed=(x2d.size * out_item + w1p.size * 2 + w2p.size * 2
                        + b1p.size * 4 + b2p.size * 4 + M * d_model * out_item))

    out2d = pl.pallas_call(
        _ffn_kernel,
        out_shape=jax.ShapeDtypeStruct((M_p, d_model_p), x.dtype),
        grid_spec=pltpu.PrefetchScalarGridSpec(
            num_scalar_prefetch=0,
            grid=grid,
            in_specs=[
                pl.BlockSpec((tm, d_model_p), lambda i, k: (i, 0)),
                pl.BlockSpec((d_model_p, tf), lambda i, k: (0, k)),
                pl.BlockSpec((1, tf), lambda i, k: (0, k)),
                pl.BlockSpec((tf, d_model_p), lambda i, k: (k, 0)),
                pl.BlockSpec((1, d_model_p), lambda i, k: (0, 0)),
            ],
            out_specs=pl.BlockSpec((tm, d_model_p), lambda i, k: (i, 0)),
            scratch_shapes=[pltpu.VMEM((tm, d_model_p), jnp.float32)],
        ),
        compiler_params=pltpu.CompilerParams(
            dimension_semantics=("parallel", "arbitrary"),
            vmem_limit_bytes=vmem_limit),
        cost_estimate=cost,
    )(xp, w1p, b1p, w2p, b2p)

    return out2d[:M, :d_model].reshape(B, S, d_model)


def _xavier_uniform(key, fan_in, fan_out):
    # Matches torch.nn.init.xavier_uniform_ on an nn.Linear weight of shape
    # (fan_out, fan_in); generated already transposed to (fan_in, fan_out).
    limit = (6.0 / (fan_in + fan_out)) ** 0.5
    return jax.random.uniform(key, (fan_in, fan_out), jnp.float32, -limit, limit)


if __name__ == "__main__":
    # Small, module-consistent shapes: (batch=2, seq=8, d_model=32), d_ff=64.
    B, S, d_model, d_ff = 2, 8, 32, 64

    key = jax.random.PRNGKey(0)
    kx, kw1, kw2 = jax.random.split(key, 3)

    x = jax.random.normal(kx, (B, S, d_model), jnp.float32)

    # Deterministic parameter init (Xavier-uniform weights, zero biases).
    w1_t = _xavier_uniform(kw1, d_model, d_ff)        # (d_model, d_ff)  == W1^T
    b1 = jnp.zeros((1, d_ff), jnp.float32)
    w2_t = _xavier_uniform(kw2, d_ff, d_model)        # (d_ff, d_model)  == W2^T
    b2 = jnp.zeros((1, d_model), jnp.float32)

    out = feed_forward(x, w1_t, b1, w2_t, b2)
    jax.block_until_ready(out)

    # Pure-JAX f32 reference.  The kernel runs its matmul operands in bf16
    # (f32 accumulation), so the tolerance is loosened accordingly.
    ref = jnp.maximum(x.reshape(-1, d_model) @ w1_t + b1, 0.0) @ w2_t + b2
    ref = ref.reshape(B, S, d_model)

    assert out.shape == (B, S, d_model)
    assert jnp.allclose(out, ref, atol=5e-2, rtol=5e-2), \
        float(jnp.max(jnp.abs(out - ref)))

    print("KERNEL_OK")
</pallas_src>

<mosaic_0001>
module attributes {stable_mosaic.version = 11 : i64} {
  func.func @_ffn_kernel(%arg0: i32, %arg1: i32, %arg2: memref<16x128xbf16, #tpu.memory_space<vmem>>, %arg3: memref<128x128xbf16, #tpu.memory_space<vmem>>, %arg4: memref<1x128xf32, #tpu.memory_space<vmem>>, %arg5: memref<128x128xbf16, #tpu.memory_space<vmem>>, %arg6: memref<1x128xf32, #tpu.memory_space<vmem>>, %arg7: memref<16x128xf32, #tpu.memory_space<vmem>>, %arg8: memref<16x128xf32, #tpu.memory_space<vmem>>) attributes {dimension_semantics = [#tpu.dimension_semantics<parallel>, #tpu.dimension_semantics<arbitrary>], iteration_bounds = array<i64: 1, 1>, scalar_prefetch = 0 : i64, scratch_operands = 1 : i64, tpu.core_type = #tpu.core_type<tc>, window_params = [{transform_indices = @transform_0, window_bounds = array<i64: 16, 128>}, {transform_indices = @transform_1, window_bounds = array<i64: 128, 128>}, {transform_indices = @transform_2, window_bounds = array<i64: 1, 128>}, {transform_indices = @transform_3, window_bounds = array<i64: 128, 128>}, {pipeline_mode = #tpu.pipeline_mode<synchronous>, transform_indices = @transform_4, window_bounds = array<i64: 1, 128>}, {transform_indices = @transform_5, window_bounds = array<i64: 16, 128>}]} {
    %c0_i32 = arith.constant 0 : i32
    %0 = arith.cmpi eq, %arg1, %c0_i32 : i32
    %1 = arith.extui %0 : i1 to i32
    %c0_i32_0 = arith.constant 0 : i32
    %2 = arith.cmpi ne, %1, %c0_i32_0 : i32
    scf.if %2 {
      %cst_16 = arith.constant 0.000000e+00 : f32
      %20 = vector.broadcast %cst_16 : f32 to vector<16x128xf32>
      %c0_17 = arith.constant 0 : index
      %c0_18 = arith.constant 0 : index
      %21 = vector.load %arg8[%c0_17, %c0_18] : memref<16x128xf32, #tpu.memory_space<vmem>>, vector<16x128xf32>
      tpu.vector_store %arg8[%c0_17, %c0_18], %20 {strides = array<i32>} : memref<16x128xf32, #tpu.memory_space<vmem>>, vector<16x128xf32>,
    } else {
    }
    %c0 = arith.constant 0 : index
    %c0_1 = arith.constant 0 : index
    %3 = vector.load %arg2[%c0, %c0_1] : memref<16x128xbf16, #tpu.memory_space<vmem>>, vector<16x128xbf16>
    %c0_2 = arith.constant 0 : index
    %c0_3 = arith.constant 0 : index
    %4 = vector.load %arg3[%c0_2, %c0_3] : memref<128x128xbf16, #tpu.memory_space<vmem>>, vector<128x128xbf16>
    %cst = arith.constant dense<0.000000e+00> : vector<16x128xf32>
    %5 = tpu.matmul %3, %4, %cst {dimension_numbers = #tpu.dot_dimension_numbers<[1], [0], [0], [1], [0, 0, 1, 1], [], []>} : vector<16x128xbf16>, vector<128x128xbf16>, vector<16x128xf32> -> vector<16x128xf32>
    %c0_4 = arith.constant 0 : index
    %c0_5 = arith.constant 0 : index
    %6 = vector.load %arg4[%c0_4, %c0_5] : memref<1x128xf32, #tpu.memory_space<vmem>>, vector<1x128xf32>
    %7 = vector.broadcast %6 : vector<1x128xf32> to vector<16x128xf32>
    %8 = arith.addf %5, %7 : vector<16x128xf32>
    %cst_6 = arith.constant 0.000000e+00 : f32
    %9 = vector.broadcast %cst_6 : f32 to vector<16x128xf32>
    %10 = arith.maximumf %8, %9 : vector<16x128xf32>
    %c0_7 = arith.constant 0 : index
    %c0_8 = arith.constant 0 : index
    %11 = vector.load %arg8[%c0_7, %c0_8] : memref<16x128xf32, #tpu.memory_space<vmem>>, vector<16x128xf32>
    %12 = arith.truncf %10 : vector<16x128xf32> to vector<16x128xbf16>
    %c0_9 = arith.constant 0 : index
    %c0_10 = arith.constant 0 : index
    %13 = vector.load %arg5[%c0_9, %c0_10] : memref<128x128xbf16, #tpu.memory_space<vmem>>, vector<128x128xbf16>
    %cst_11 = arith.constant dense<0.000000e+00> : vector<16x128xf32>
    %14 = tpu.matmul %12, %13, %cst_11 {dimension_numbers = #tpu.dot_dimension_numbers<[1], [0], [0], [1], [0, 0, 1, 1], [], []>} : vector<16x128xbf16>, vector<128x128xbf16>, vector<16x128xf32> -> vector<16x128xf32>
    %15 = arith.addf %11, %14 : vector<16x128xf32>
    %c0_12 = arith.constant 0 : index
    %c0_13 = arith.constant 0 : index
    %16 = vector.load %arg8[%c0_12, %c0_13] : memref<16x128xf32, #tpu.memory_space<vmem>>, vector<16x128xf32>
    tpu.vector_store %arg8[%c0_12, %c0_13], %15 {strides = array<i32>} : memref<16x128xf32, #tpu.memory_space<vmem>>, vector<16x128xf32>,
    %c0_i32_14 = arith.constant 0 : i32
    %17 = arith.cmpi eq, %arg1, %c0_i32_14 : i32
    %18 = arith.extui %17 : i1 to i32
    %c0_i32_15 = arith.constant 0 : i32
    %19 = arith.cmpi ne, %18, %c0_i32_15 : i32
    scf.if %19 {
      %c0_16 = arith.constant 0 : index
      %c0_17 = arith.constant 0 : index
      %20 = vector.load %arg8[%c0_16, %c0_17] : memref<16x128xf32, #tpu.memory_space<vmem>>, vector<16x128xf32>
      %c0_18 = arith.constant 0 : index
      %c0_19 = arith.constant 0 : index
      %21 = vector.load %arg6[%c0_18, %c0_19] : memref<1x128xf32, #tpu.memory_space<vmem>>, vector<1x128xf32>
      %22 = vector.broadcast %21 : vector<1x128xf32> to vector<16x128xf32>
      %23 = arith.addf %20, %22 : vector<16x128xf32>
      %c0_20 = arith.constant 0 : index
      %c0_21 = arith.constant 0 : index
      %24 = vector.load %arg7[%c0_20, %c0_21] : memref<16x128xf32, #tpu.memory_space<vmem>>, vector<16x128xf32>
      tpu.vector_store %arg7[%c0_20, %c0_21], %23 {strides = array<i32>} : memref<16x128xf32, #tpu.memory_space<vmem>>, vector<16x128xf32>,
    } else {
    }
    return
  }
  func.func @transform_0(%arg0: i32, %arg1: i32) -> (i32, i32) {
    %c0_i32 = arith.constant 0 : i32
    %c0_i32_0 = arith.constant 0 : i32
    return %arg0, %c0_i32 : i32, i32
  }
  func.func @transform_1(%arg0: i32, %arg1: i32) -> (i32, i32) {
    %c0_i32 = arith.constant 0 : i32
    %c0_i32_0 = arith.constant 0 : i32
    return %c0_i32, %arg1 : i32, i32
  }
  func.func @transform_2(%arg0: i32, %arg1: i32) -> (i32, i32) {
    %c0_i32 = arith.constant 0 : i32
    %c0_i32_0 = arith.constant 0 : i32
    return %c0_i32, %arg1 : i32, i32
  }
  func.func @transform_3(%arg0: i32, %arg1: i32) -> (i32, i32) {
    %c0_i32 = arith.constant 0 : i32
    %c0_i32_0 = arith.constant 0 : i32
    return %arg1, %c0_i32 : i32, i32
  }
  func.func @transform_4(%arg0: i32, %arg1: i32) -> (i32, i32) {
    %c0_i32 = arith.constant 0 : i32
    %c0_i32_0 = arith.constant 0 : i32
    %c0_i32_1 = arith.constant 0 : i32
    return %c0_i32, %c0_i32_0 : i32, i32
  }
  func.func @transform_5(%arg0: i32, %arg1: i32) -> (i32, i32) {
    %c0_i32 = arith.constant 0 : i32
    %c0_i32_0 = arith.constant 0 : i32
    return %arg0, %c0_i32 : i32, i32
  }
}

</mosaic_0001>

<bundles_post_ra>
// kernel: feed_forward.1
= control target key start
LH: loop header
LB: loop body
LE: loop exit
PB: predicated region body
PF: predicated region fallthrough
CT: control target
= control target key end

     0   :  { %v377_v0 = vmov 0.0   ;;  %vm378_vm0 = vmmov 0   ;;  %s472_s1 = inlined_call_operand.vmem [shape: bf16[128,128], index: 1, kind: input, shape index: {}]   ;;  %s473_s3 = inlined_call_operand.vmem [shape: bf16[128,128], index: 3, kind: input, shape index: {}]   ;;  %s474_s0 = inlined_call_operand.vmem [shape: bf16[16,128], index: 0, kind: input, shape index: {}]   ;;  %s475_s2 = inlined_call_operand.vmem [shape: f32[1,128], index: 2, kind: input, shape index: {}]   ;;  %s476_s4 = inlined_call_operand.vmem [shape: f32[1,128], index: 4, kind: input, shape index: {}]   ;;  %s477_s5 = inlined_call_operand.vmem [shape: f32[16,128], index: 5, kind: output, shape index: {}]  }
   0x1   :  { %318 = vmatprep.subr.bf16.mxu0 %v377_v0  ;;  %v360_v1 = vld [vmem:[%s472_s1] sm:$0xff]   ;;  %334 = vmatprep.mubr.msk.bf16.mxu0 %vm378_vm0, %v377_v0  ;;  %v361_v2 = vld [vmem:[%s472_s1 + $0x8] sm:$0xff]   ;;  %v362_v3 = vld [vmem:[%s472_s1 + $0x10] sm:$0xff]  }
   0x2   :  { %338 = vmatprep.subr.bf16.mxu1 %v377_v0  ;;  %354 = vmatprep.mubr.msk.bf16.mxu1 %vm378_vm0, %v377_v0  ;;  %v369_v4 = vld [vmem:[%s473_s3] sm:$0xff]   ;;  %v363_v5 = vld [vmem:[%s472_s1 + $0x18] sm:$0xff]   ;;  %v370_v6 = vld [vmem:[%s473_s3 + $0x8] sm:$0xff]  }
   0x3   :  { %319 = vmatpush3.bf16.msra.mxu0 %v360_v1  ;;  %339 = vmatpush3.bf16.msra.mxu1 %v369_v4  ;;  %v364_v7 = vld [vmem:[%s472_s1 + $0x20] sm:$0xff]   ;;  %v371_v8 = vld [vmem:[%s473_s3 + $0x10] sm:$0xff]   ;;  %v365_v9 = vld [vmem:[%s472_s1 + $0x28] sm:$0xff]  }
   0x4   :  { %320 = vmatprep.subr.bf16.mxu0 %v377_v0  ;;  %340 = vmatprep.subr.bf16.mxu1 %v377_v0  ;;  %v372_v10 = vld [vmem:[%s473_s3 + $0x18] sm:$0xff]   ;;  %v366_v11 = vld [vmem:[%s472_s1 + $0x30] sm:$0xff]   ;;  %v373_v12 = vld [vmem:[%s473_s3 + $0x20] sm:$0xff]  }
   0x5   :  { %v367_v13 = vld [vmem:[%s472_s1 + $0x38] sm:$0xff]   ;;  %v374_v14 = vld [vmem:[%s473_s3 + $0x28] sm:$0xff]   ;;  %v368_v15 = vld [vmem:[%s474_s0] sm:$0xff]  }
   0x6   :  { %v375_v16 = vld [vmem:[%s473_s3 + $0x30] sm:$0xff]   ;;  %v376_v17 = vld [vmem:[%s473_s3 + $0x38] sm:$0xff]   ;;  %v281_v18 = vld [vmem:[%s475_s2] ss:$0 sm:$0xff] }
   0x7   :  { %321 = vmatpush3.bf16.msra.mxu0 %v361_v2  ;;  %341 = vmatpush3.bf16.msra.mxu1 %v370_v6  ;;  %v299_v28 = vld [vmem:[%s476_s4] ss:$0 sm:$0xff] }
   0x8   :  { %322 = vmatprep.subr.bf16.mxu0 %v377_v0  ;;  %342 = vmatprep.subr.bf16.mxu1 %v377_v0 }
   0xb   :  { %323 = vmatpush3.bf16.msra.mxu0 %v362_v3  ;;  %343 = vmatpush3.bf16.msra.mxu1 %v371_v8 }
   0xc   :  { %324 = vmatprep.subr.bf16.mxu0 %v377_v0  ;;  %344 = vmatprep.subr.bf16.mxu1 %v377_v0 }
   0xf   :  { %325 = vmatpush3.bf16.msra.mxu0 %v363_v5  ;;  %345 = vmatpush3.bf16.msra.mxu1 %v372_v10 }
  0x10   :  { %326 = vmatprep.subr.bf16.mxu0 %v377_v0  ;;  %346 = vmatprep.subr.bf16.mxu1 %v377_v0 }
  0x13   :  { %327 = vmatpush3.bf16.msra.mxu0 %v364_v7  ;;  %347 = vmatpush3.bf16.msra.mxu1 %v373_v12 }
  0x14   :  { %328 = vmatprep.subr.bf16.mxu0 %v377_v0  ;;  %348 = vmatprep.subr.bf16.mxu1 %v377_v0 }
  0x17   :  { %329 = vmatpush3.bf16.msra.mxu0 %v365_v9  ;;  %349 = vmatpush3.bf16.msra.mxu1 %v374_v14 }
  0x18   :  { %330 = vmatprep.subr.bf16.mxu0 %v377_v0  ;;  %350 = vmatprep.subr.bf16.mxu1 %v377_v0 }
  0x1b   :  { %331 = vmatpush3.bf16.msra.mxu0 %v366_v11  ;;  %351 = vmatpush3.bf16.msra.mxu1 %v375_v16 }
  0x1c   :  { %332 = vmatprep.subr.bf16.mxu0 %v377_v0  ;;  %352 = vmatprep.subr.bf16.mxu1 %v377_v0 }
  0x1f   :  { %333 = vmatpush3.bf16.msra.mxu0 %v367_v13  ;;  %353 = vmatpush3.bf16.msra.mxu1 %v376_v17 }
  0x22   :  { %335 = vmatmul.mubr.bf16.vlgmr.msra.gmra.mrb[0].mxu0 %v368_v15 }
  0xf5   :  { %v140_v19 = vpop.f32.mrb[0].mxu0 }
  0xf6   :  { %v141_v20 = vadd.f32 %v281_v18, %v140_v19  ;;  %v336_v21 = vpop.f32.mrb[1].mxu0 }
  0xf7   :  { %v143_v22 = vpop.f32.mrb[2].mxu0 }
  0xf8   :  { %v144_v23 = vadd.f32 %v281_v18, %v143_v22  ;;  %v337_v24 = vpop.f32.mrb[3].mxu0  ;;  %v147_v25 = vmax.f32 %v141_v20, 0.0 }
  0xfa   :  { %v148_v26 = vmax.f32 %v144_v23, 0.0 }
  0xfc   :  { %v151_v27 = vpack.c.bf16 %v148_v26, %v147_v25 }
  0xfe   :  { %355 = vmatmul.mubr.bf16.vlgmr.msra.gmra.mrb[0].mxu1 %v151_v27 }
 0x1d1   :  { %v250_v29 = vpop.f32.mrb[0].mxu1 }
 0x1d2   :  { %v273_v30 = vadd.f32 %v299_v28, %v250_v29  ;;  %v356_v31 = vpop.f32.mrb[1].mxu1 }
 0x1d3   :  { %v253_v32 = vpop.f32.mrb[2].mxu1 }
 0x1d4   :  { %275 = vst [vmem:[%s477_s5] sm:$0xff] %v273_v30  ;;  %v274_v33 = vadd.f32 %v299_v28, %v253_v32  ;;  %v357_v34 = vpop.f32.mrb[3].mxu1 }
 0x1d6   :  { %276 = vst [vmem:[%s477_s5 + $0x8] sm:$0xff] %v274_v33 }

</bundles_post_ra>
